<compile_context>
chip_gen: v7x
topology: tpu7x:2x2x1
jax: 0.10.0
libtpu: 0.0.40
codegen_flags: <defaults>
</compile_context>

<pallas_src>
import functools

import jax
import jax.numpy as jnp
from jax.experimental import pallas as pl
from jax.experimental.pallas import tpu as pltpu

H1, H2, H3 = 128, 64, 32
BN_EPS = 1e-5
LANE = 128
TB_MAX = 2048          # max batch rows per grid step (VMEM use ~1-3 MiB total)


def _round_up(x, m):
    return (x + m - 1) // m * m


def _cdiv(a, b):
    return (a + b - 1) // b


def _dqn_kernel(x_ref, w1_ref, w2_ref, w3_ref, w4_ref, bias_ref, o_ref):
    """fc1 -> (BN1 folded) -> relu -> fc2 -> (BN2 folded) -> relu -> fc3 -> relu -> fc4."""
    cd = w1_ref.dtype                       # MXU operand dtype (f32 or bf16)
    out_dim = o_ref.shape[-1]

    x = x_ref[...].astype(cd)               # in-kernel cast: VPU slot, no extra HBM pass
    b = bias_ref[...]                       # (4, BIAS_W) float32, packed biases

    h = jnp.dot(x, w1_ref[...], preferred_element_type=jnp.float32)
    h = jnp.maximum(h + b[0:1, :H1], 0.0)   # BN1 already folded into w1/b1
    # TODO(synk): training-mode dropout (pltpu.prng_random_bits mask) not emitted.

    h = jnp.dot(h.astype(cd), w2_ref[...], preferred_element_type=jnp.float32)
    h = jnp.maximum(h + b[1:2, :H2], 0.0)   # BN2 already folded into w2/b2

    h = jnp.dot(h.astype(cd), w3_ref[...], preferred_element_type=jnp.float32)
    h = jnp.maximum(h + b[2:3, :H3], 0.0)

    out = jnp.dot(h.astype(cd), w4_ref[...], preferred_element_type=jnp.float32)
    o_ref[...] = (out + b[3:4, :out_dim]).astype(o_ref.dtype)


def init_dqn_params(key, input_dim, output_dim):
    """Parameter init matching the PyTorch module shapes (weights pre-transposed
    to (in_features, out_features)).  BN running stats are made non-trivial so
    the fold-into-Linear path is actually exercised."""
    ks = jax.random.split(key, 16)

    def linear(kw, kb, fan_in, fan_out):
        bound = 1.0 / jnp.sqrt(fan_in)
        w = jax.random.uniform(kw, (fan_in, fan_out), jnp.float32, -bound, bound)
        b = jax.random.uniform(kb, (1, fan_out), jnp.float32, -bound, bound)
        return w, b

    w1, b1 = linear(ks[0], ks[1], input_dim, H1)
    w2, b2 = linear(ks[2], ks[3], H1, H2)
    w3, b3 = linear(ks[4], ks[5], H2, H3)
    w4, b4 = linear(ks[6], ks[7], H3, output_dim)

    def bn(kg, kb, km, kv, h):
        return dict(
            gamma=jax.random.uniform(kg, (1, h), jnp.float32, 0.5, 1.5),
            beta=0.1 * jax.random.normal(kb, (1, h), jnp.float32),
            mean=0.5 * jax.random.normal(km, (1, h), jnp.float32),
            var=jax.random.uniform(kv, (1, h), jnp.float32, 0.5, 2.0),
        )

    bn1 = bn(ks[8], ks[9], ks[10], ks[11], H1)
    bn2 = bn(ks[12], ks[13], ks[14], ks[15], H2)
    return dict(w1=w1, b1=b1, w2=w2, b2=b2, w3=w3, b3=b3, w4=w4, b4=b4,
                bn1=bn1, bn2=bn2)


@functools.partial(jax.jit,
                   static_argnames=("output_dim", "compute_dtype", "out_dtype"))
def dqn_forward(x, params, output_dim, compute_dtype=jnp.float32, out_dtype=None):
    """x: (B, input_dim) float32 -> (B, output_dim) in out_dtype (default: compute_dtype)."""
    B, d_in = x.shape
    apply_bn = B > 1                         # static shape check, mirrors PyTorch guard
    cd = compute_dtype
    od = out_dtype if out_dtype is not None else cd

    # ---- fold eval-mode BatchNorm into the preceding Linear (exact) ----
    def fold(w, b, bn):
        if not apply_bn:
            return w, b
        s = bn["gamma"] / jnp.sqrt(bn["var"] + BN_EPS)   # (1, H)
        t = bn["beta"] - bn["mean"] * s
        return w * s, b * s + t

    w1, b1 = fold(params["w1"], params["b1"], params["bn1"])
    w2, b2 = fold(params["w2"], params["b2"], params["bn2"])
    w3, b3 = params["w3"], params["b3"]
    w4, b4 = params["w4"], params["b4"]      # NOT padded: output stays (B, output_dim)

    # ---- pack all biases into one (4, BIAS_W) f32 slab (single DMA) ----
    bias_w = max(H1, H2, H3, output_dim)
    def lane_pad(v):
        return jnp.pad(v, ((0, 0), (0, bias_w - v.shape[1])))
    bias = jnp.concatenate(
        [lane_pad(b1), lane_pad(b2), lane_pad(b3), lane_pad(b4)], axis=0
    ).astype(jnp.float32)

    # ---- MXU weight operands in compute_dtype (x is cast inside the kernel) ----
    w1, w2, w3, w4 = (w.astype(cd) for w in (w1, w2, w3, w4))

    # ---- batch tiling (no padding of x, no output slice) ----
    # bf16 rows pack 2-per-sublane -> 16-row alignment; f32 -> 8-row alignment.
    align = 16 if jnp.dtype(cd) == jnp.dtype(jnp.bfloat16) else 8
    steps = max(1, _cdiv(B, TB_MAX))
    if B > align:
        steps = max(steps, 2)                # v7x: keep both TensorCores busy
    if steps > 1 and steps % 2 == 1:
        steps += 1                           # even step count -> balanced TC split
    tb = _round_up(_cdiv(B, steps), align)
    grid = _cdiv(B, tb)                      # ragged last block handled by Pallas

    # ---- advisory cost estimate (kernel is tiny; helps XLA scheduling) ----
    flops = 2 * B * (d_in * H1 + H1 * H2 + H2 * H3 + H3 * output_dim)
    w_bytes = (d_in * H1 + H1 * H2 + H2 * H3 + H3 * output_dim) * jnp.dtype(cd).itemsize
    bytes_accessed = (B * d_in * x.dtype.itemsize + w_bytes
                      + 4 * bias_w * 4 + B * output_dim * jnp.dtype(od).itemsize)

    out = pl.pallas_call(
        _dqn_kernel,
        out_shape=jax.ShapeDtypeStruct((B, output_dim), od),
        grid=(grid,),
        in_specs=[
            pl.BlockSpec((tb, d_in), lambda i: (i, 0)),      # x: tiled over batch
            pl.BlockSpec((d_in, H1), lambda i: (0, 0)),      # weights: VMEM-resident
            pl.BlockSpec((H1, H2), lambda i: (0, 0)),
            pl.BlockSpec((H2, H3), lambda i: (0, 0)),
            pl.BlockSpec((H3, output_dim), lambda i: (0, 0)),
            pl.BlockSpec((4, bias_w), lambda i: (0, 0)),     # packed biases
        ],
        out_specs=pl.BlockSpec((tb, output_dim), lambda i: (i, 0)),
        compiler_params=pltpu.CompilerParams(
            dimension_semantics=("parallel",)),              # v7x: 2 TCs share batch
        cost_estimate=pl.CostEstimate(
            flops=flops, transcendentals=0, bytes_accessed=bytes_accessed),
    )(x, w1, w2, w3, w4, bias)

    return out


def dqn_reference(x, params):
    """Pure-JAX reference with the PyTorch module's exact (unfused) structure."""
    apply_bn = x.shape[0] > 1

    def bn_apply(h, bn):
        return (h - bn["mean"]) / jnp.sqrt(bn["var"] + BN_EPS) * bn["gamma"] + bn["beta"]

    h = x @ params["w1"] + params["b1"]
    if apply_bn:
        h = bn_apply(h, params["bn1"])
    h = jnp.maximum(h, 0.0)                  # dropout: identity in eval mode
    h = h @ params["w2"] + params["b2"]
    if apply_bn:
        h = bn_apply(h, params["bn2"])
    h = jnp.maximum(h, 0.0)
    h = jnp.maximum(h @ params["w3"] + params["b3"], 0.0)
    return h @ params["w4"] + params["b4"]


if __name__ == "__main__":
    input_dim, output_dim = 32, 8

    key = jax.random.PRNGKey(0)
    k_params, k_x1, k_x2, k_x3 = jax.random.split(key, 4)
    params = init_dqn_params(k_params, input_dim, output_dim)

    # 1) small batch, f32 compute: BN active and folded, tight tolerance.
    x = jax.random.normal(k_x1, (8, input_dim), jnp.float32)
    out = jax.block_until_ready(dqn_forward(x, params, output_dim))
    ref = dqn_reference(x, params)
    assert out.shape == (8, output_dim), out.shape
    assert out.dtype == jnp.float32, out.dtype
    assert jnp.allclose(out, ref, atol=1e-3, rtol=1e-3), "mismatch (batch=8, f32)"

    # 2) batch == 1: BatchNorm skipped (matches the PyTorch `if x.shape[0] > 1` guard).
    x1 = jax.random.normal(k_x2, (1, input_dim), jnp.float32)
    out1 = jax.block_until_ready(dqn_forward(x1, params, output_dim))
    ref1 = dqn_reference(x1, params)
    assert out1.shape == (1, output_dim), out1.shape
    assert jnp.allclose(out1, ref1, atol=1e-3, rtol=1e-3), "mismatch (batch=1)"

    # 3) large, non-tile-aligned batch with bf16 MXU operands and bf16 output:
    #    exercises the cdiv grid (2 steps of 608 rows, ragged last block), the
    #    unpadded masked-store output, and the in-kernel cast.
    xb = jax.random.normal(k_x3, (1200, input_dim), jnp.float32)
    outb = jax.block_until_ready(
        dqn_forward(xb, params, output_dim, compute_dtype=jnp.bfloat16))
    refb = dqn_reference(xb, params)
    assert outb.shape == (1200, output_dim), outb.shape
    assert outb.dtype == jnp.bfloat16, outb.dtype
    assert jnp.allclose(outb.astype(jnp.float32), refb, atol=5e-2, rtol=5e-2), \
        "mismatch (batch=1200, bf16)"

    # 3b) same batch, bf16 compute but f32 output requested by the caller.
    outb32 = jax.block_until_ready(
        dqn_forward(xb, params, output_dim, compute_dtype=jnp.bfloat16,
                    out_dtype=jnp.float32))
    assert outb32.dtype == jnp.float32
    assert jnp.allclose(outb32, refb, atol=5e-2, rtol=5e-2), "mismatch (bf16/f32 out)"

    print("KERNEL_OK")
</pallas_src>

<mosaic_0001>
module attributes {stable_mosaic.version = 11 : i64} {
  func.func @_dqn_kernel(%arg0: i32, %arg1: memref<8x32xf32, #tpu.memory_space<vmem>>, %arg2: memref<32x128xf32, #tpu.memory_space<vmem>>, %arg3: memref<128x64xf32, #tpu.memory_space<vmem>>, %arg4: memref<64x32xf32, #tpu.memory_space<vmem>>, %arg5: memref<32x8xf32, #tpu.memory_space<vmem>>, %arg6: memref<4x128xf32, #tpu.memory_space<vmem>>, %arg7: memref<8x8xf32, #tpu.memory_space<vmem>>) attributes {dimension_semantics = [#tpu.dimension_semantics<parallel>], iteration_bounds = array<i64: 1>, scalar_prefetch = 0 : i64, scratch_operands = 0 : i64, tpu.core_type = #tpu.core_type<tc>, window_params = [{transform_indices = @transform_0, window_bounds = array<i64: 8, 32>}, {pipeline_mode = #tpu.pipeline_mode<synchronous>, transform_indices = @transform_1, window_bounds = array<i64: 32, 128>}, {pipeline_mode = #tpu.pipeline_mode<synchronous>, transform_indices = @transform_2, window_bounds = array<i64: 128, 64>}, {pipeline_mode = #tpu.pipeline_mode<synchronous>, transform_indices = @transform_3, window_bounds = array<i64: 64, 32>}, {pipeline_mode = #tpu.pipeline_mode<synchronous>, transform_indices = @transform_4, window_bounds = array<i64: 32, 8>}, {pipeline_mode = #tpu.pipeline_mode<synchronous>, transform_indices = @transform_5, window_bounds = array<i64: 4, 128>}, {transform_indices = @transform_6, window_bounds = array<i64: 8, 8>}]} {
    %c0 = arith.constant 0 : index
    %c0_0 = arith.constant 0 : index
    %0 = vector.load %arg1[%c0, %c0_0] : memref<8x32xf32, #tpu.memory_space<vmem>>, vector<8x32xf32>
    %c0_1 = arith.constant 0 : index
    %c0_2 = arith.constant 0 : index
    %1 = vector.load %arg6[%c0_1, %c0_2] : memref<4x128xf32, #tpu.memory_space<vmem>>, vector<4x128xf32>
    %c0_3 = arith.constant 0 : index
    %c0_4 = arith.constant 0 : index
    %2 = vector.load %arg2[%c0_3, %c0_4] : memref<32x128xf32, #tpu.memory_space<vmem>>, vector<32x128xf32>
    %cst = arith.constant dense<0.000000e+00> : vector<8x128xf32>
    %3 = tpu.matmul %0, %2, %cst {dimension_numbers = #tpu.dot_dimension_numbers<[1], [0], [0], [1], [0, 0, 1, 1], [], []>} : vector<8x32xf32>, vector<32x128xf32>, vector<8x128xf32> -> vector<8x128xf32>
    %4 = vector.extract_strided_slice %1 {offsets = [0, 0], sizes = [1, 128], strides = [1, 1]} : vector<4x128xf32> to vector<1x128xf32>
    %5 = vector.broadcast %4 : vector<1x128xf32> to vector<8x128xf32>
    %6 = arith.addf %3, %5 : vector<8x128xf32>
    %cst_5 = arith.constant 0.000000e+00 : f32
    %7 = vector.broadcast %cst_5 : f32 to vector<8x128xf32>
    %8 = arith.maximumf %6, %7 : vector<8x128xf32>
    %c0_6 = arith.constant 0 : index
    %c0_7 = arith.constant 0 : index
    %9 = vector.load %arg3[%c0_6, %c0_7] : memref<128x64xf32, #tpu.memory_space<vmem>>, vector<128x64xf32>
    %cst_8 = arith.constant dense<0.000000e+00> : vector<8x64xf32>
    %10 = tpu.matmul %8, %9, %cst_8 {dimension_numbers = #tpu.dot_dimension_numbers<[1], [0], [0], [1], [0, 0, 1, 1], [], []>} : vector<8x128xf32>, vector<128x64xf32>, vector<8x64xf32> -> vector<8x64xf32>
    %11 = vector.extract_strided_slice %1 {offsets = [1, 0], sizes = [1, 64], strides = [1, 1]} : vector<4x128xf32> to vector<1x64xf32>
    %12 = vector.broadcast %11 : vector<1x64xf32> to vector<8x64xf32>
    %13 = arith.addf %10, %12 : vector<8x64xf32>
    %cst_9 = arith.constant 0.000000e+00 : f32
    %14 = vector.broadcast %cst_9 : f32 to vector<8x64xf32>
    %15 = arith.maximumf %13, %14 : vector<8x64xf32>
    %c0_10 = arith.constant 0 : index
    %c0_11 = arith.constant 0 : index
    %16 = vector.load %arg4[%c0_10, %c0_11] : memref<64x32xf32, #tpu.memory_space<vmem>>, vector<64x32xf32>
    %cst_12 = arith.constant dense<0.000000e+00> : vector<8x32xf32>
    %17 = tpu.matmul %15, %16, %cst_12 {dimension_numbers = #tpu.dot_dimension_numbers<[1], [0], [0], [1], [0, 0, 1, 1], [], []>} : vector<8x64xf32>, vector<64x32xf32>, vector<8x32xf32> -> vector<8x32xf32>
    %18 = vector.extract_strided_slice %1 {offsets = [2, 0], sizes = [1, 32], strides = [1, 1]} : vector<4x128xf32> to vector<1x32xf32>
    %19 = vector.broadcast %18 : vector<1x32xf32> to vector<8x32xf32>
    %20 = arith.addf %17, %19 : vector<8x32xf32>
    %cst_13 = arith.constant 0.000000e+00 : f32
    %21 = vector.broadcast %cst_13 : f32 to vector<8x32xf32>
    %22 = arith.maximumf %20, %21 : vector<8x32xf32>
    %c0_14 = arith.constant 0 : index
    %c0_15 = arith.constant 0 : index
    %23 = vector.load %arg5[%c0_14, %c0_15] : memref<32x8xf32, #tpu.memory_space<vmem>>, vector<32x8xf32>
    %cst_16 = arith.constant dense<0.000000e+00> : vector<8x8xf32>
    %24 = tpu.matmul %22, %23, %cst_16 {dimension_numbers = #tpu.dot_dimension_numbers<[1], [0], [0], [1], [0, 0, 1, 1], [], []>} : vector<8x32xf32>, vector<32x8xf32>, vector<8x8xf32> -> vector<8x8xf32>
    %25 = vector.extract_strided_slice %1 {offsets = [3, 0], sizes = [1, 8], strides = [1, 1]} : vector<4x128xf32> to vector<1x8xf32>
    %26 = vector.broadcast %25 : vector<1x8xf32> to vector<8x8xf32>
    %27 = arith.addf %24, %26 : vector<8x8xf32>
    %c0_17 = arith.constant 0 : index
    %c0_18 = arith.constant 0 : index
    %28 = vector.load %arg7[%c0_17, %c0_18] : memref<8x8xf32, #tpu.memory_space<vmem>>, vector<8x8xf32>
    tpu.vector_store %arg7[%c0_17, %c0_18], %27 {strides = array<i32>} : memref<8x8xf32, #tpu.memory_space<vmem>>, vector<8x8xf32>,
    return
  }
  func.func @transform_0(%arg0: i32) -> (i32, i32) {
    %c0_i32 = arith.constant 0 : i32
    %c0_i32_0 = arith.constant 0 : i32
    return %arg0, %c0_i32 : i32, i32
  }
  func.func @transform_1(%arg0: i32) -> (i32, i32) {
    %c0_i32 = arith.constant 0 : i32
    %c0_i32_0 = arith.constant 0 : i32
    %c0_i32_1 = arith.constant 0 : i32
    return %c0_i32, %c0_i32_0 : i32, i32
  }
  func.func @transform_2(%arg0: i32) -> (i32, i32) {
    %c0_i32 = arith.constant 0 : i32
    %c0_i32_0 = arith.constant 0 : i32
    %c0_i32_1 = arith.constant 0 : i32
    return %c0_i32, %c0_i32_0 : i32, i32
  }
  func.func @transform_3(%arg0: i32) -> (i32, i32) {
    %c0_i32 = arith.constant 0 : i32
    %c0_i32_0 = arith.constant 0 : i32
    %c0_i32_1 = arith.constant 0 : i32
    return %c0_i32, %c0_i32_0 : i32, i32
  }
  func.func @transform_4(%arg0: i32) -> (i32, i32) {
    %c0_i32 = arith.constant 0 : i32
    %c0_i32_0 = arith.constant 0 : i32
    %c0_i32_1 = arith.constant 0 : i32
    return %c0_i32, %c0_i32_0 : i32, i32
  }
  func.func @transform_5(%arg0: i32) -> (i32, i32) {
    %c0_i32 = arith.constant 0 : i32
    %c0_i32_0 = arith.constant 0 : i32
    %c0_i32_1 = arith.constant 0 : i32
    return %c0_i32, %c0_i32_0 : i32, i32
  }
  func.func @transform_6(%arg0: i32) -> (i32, i32) {
    %c0_i32 = arith.constant 0 : i32
    %c0_i32_0 = arith.constant 0 : i32
    return %arg0, %c0_i32 : i32, i32
  }
}

</mosaic_0001>

<bundles_post_ra>
// kernel: dqn_forward.1
= control target key start
LH: loop header
LB: loop body
LE: loop exit
PB: predicated region body
PF: predicated region fallthrough
CT: control target
= control target key end

     0   :  { %v575_v3 = vmov 0.0|0.0   ;;  %vm576_vm0 = vmmov 0   ;;  %v577_v6 = vmov 0.0   ;;  %s754_s0 = inlined_call_operand.vmem [shape: f32[8,32], index: 0, kind: input, shape index: {}]   ;;  %s755_s1 = inlined_call_operand.vmem [shape: f32[32,128], index: 1, kind: input, shape index: {}]   ;;  %s756_s2 = inlined_call_operand.vmem [shape: f32[128,64], index: 2, kind: input, shape index: {}]   ;;  %s757_s3 = inlined_call_operand.vmem [shape: f32[64,32], index: 3, kind: input, shape index: {}]   ;;  %s758_s4 = inlined_call_operand.vmem [shape: f32[32,8], index: 4, kind: input, shape index: {}]   ;;  %s759_s5 = inlined_call_operand.vmem [shape: f32[4,128], index: 5, kind: input, shape index: {}]   ;;  %s760_s6 = inlined_call_operand.hbm [shape: f32[8,8], index: 6, kind: output, shape index: {}]  }
   0x1   :  { %v26_v0 = vld [vmem:[%s755_s1] sm:$0xff]  ;;  %v27_v1 = vld [vmem:[%s755_s1 + $0x8] sm:$0xff]  ;;  %v28_v2 = vld [vmem:[%s755_s1 + $0x10] sm:$0xff]  ;;  %499 = vmatprep.subr.bf16.mxu0 %v575_v3  ;;  %431 = vmatprep.mubr.msk.f32.mxu0 %vm576_vm0, %v577_v6 }
   0x2   :  { %v500_v4 = vpack.c.bf16 %v27_v1, %v26_v0  ;;  %v29_v5 = vld [vmem:[%s755_s1 + $0x18] sm:$0xff]  ;;  %v109_v7 = vld [vmem:[%s756_s2] sm:$0xff]  ;;  %505 = vmatprep.subr.bf16.mxu1 %v575_v3  ;;  %v110_v8 = vld [vmem:[%s756_s2 + $0x8] sm:$0xff]  ;;  %466 = vmatprep.mubr.msk.f32.mxu1 %vm576_vm0, %v577_v6 }
   0x3   :  { %v111_v9 = vld [vmem:[%s756_s2 + $0x10] sm:$0xff]  ;;  %v112_v10 = vld [vmem:[%s756_s2 + $0x18] sm:$0xff]  ;;  %v503_v11 = vpack.c.bf16 %v29_v5, %v28_v2  ;;  %v506_v12 = vpack.c.bf16 %v110_v8, %v109_v7  ;;  %v113_v14 = vld [vmem:[%s756_s2 + $0x20] sm:$0xff] }
   0x4   :  { %501 = vmatpush3.bf16.msra.mxu0 %v500_v4  ;;  %v509_v13 = vpack.c.bf16 %v112_v10, %v111_v9  ;;  %v114_v15 = vld [vmem:[%s756_s2 + $0x28] sm:$0xff] }
   0x5   :  { %502 = vmatprep.subr.bf16.mxu0 %v575_v3  ;;  %507 = vmatpush3.bf16.msra.mxu1 %v506_v12 }
   0x6   :  { %508 = vmatprep.subr.bf16.mxu1 %v575_v3 }
   0x7   :  { %11 = vsyncpa [#allocation3], 0  ;;  %v24_v16 = vld [vmem:[%s754_s0] sm:$0xff]  ;;  %vm34_vm1 = vcmask 261120   ;;  %v512_v17 = vpack.c.bf16 %v114_v15, %v113_v14  ;;  %v115_v18 = vld [vmem:[%s756_s2 + $0x30] sm:$0xff]  ;;  %v30_v42 = vlaneseq  ;;  %vm212_vm2 = vcmask 523264  }
   0x8   :  { %504 = vmatpush3.bf16.msra.mxu0 %v503_v11  ;;  %v116_v19 = vld [vmem:[%s756_s2 + $0x38] sm:$0xff]  ;;  %v117_v21 = vld [vmem:[%s756_s2 + $0x40] sm:$0xff]  ;;  %v118_v22 = vld [vmem:[%s756_s2 + $0x48] sm:$0xff]  ;;  %s578_s10 = smov [#allocation2]   ;;  %vm368_vm3 = vcmask 64512  }
   0x9   :  { %529 = vmatprep.subr.bf16.mxu0 %v575_v3  ;;  %510 = vmatpush3.bf16.msra.mxu1 %v509_v13  ;;  %v515_v20 = vpack.c.bf16 %v116_v19, %v115_v18  ;;  %v518_v23 = vpack.c.bf16 %v118_v22, %v117_v21  ;;  %v119_v24 = vld [vmem:[%s756_s2 + $0x50] sm:$0xff]  ;;  %v120_v25 = vld [vmem:[%s756_s2 + $0x58] sm:$0xff]  ;;  %v121_v27 = vld [vmem:[%s756_s2 + $0x60] sm:$0xff]  ;;  %v31_v43 = vshrl.u32 %v30_v42, 7  ;;  %s376_s1 = sshll.u32 %s578_s10, 4  ;;  %s377_s1 = int_to_ptr.vmem [resolvable:$true] %s376_s1 }
   0xa   :  { %511 = vmatprep.subr.bf16.mxu1 %v575_v3  ;;  %v521_v26 = vpack.c.bf16 %v120_v25, %v119_v24  ;;  %v122_v28 = vld [vmem:[%s756_s2 + $0x68] sm:$0xff]  ;;  %v123_v30 = vld [vmem:[%s756_s2 + $0x70] sm:$0xff]  ;;  %v124_v31 = vld [vmem:[%s756_s2 + $0x78] sm:$0xff]  ;;  %p556_p1 = scmp.lt.s32.totalorder %s377_s1, %s377_s1 }
   0xb   :  { %432 = vmatmul.mubr.msk.f32.vlgmr.msra.gmra.mrb[0].mxu0 %vm34_vm1, %v24_v16  ;;  %v524_v29 = vpack.c.bf16 %v122_v28, %v121_v27  ;;  %v527_v32 = vpack.c.bf16 %v124_v31, %v123_v30  ;;  %v200_v33 = vld [vmem:[%s757_s3] sm:$0xff]  ;;  %v201_v34 = vld [vmem:[%s757_s3 + $0x8] sm:$0xff]  ;;  %v202_v35 = vld [vmem:[%s757_s3 + $0x10] sm:$0xff]  ;;  %v32_v44 = vsub.s32 0, %v31_v43  ;;  %v127_v54 = vsub.s32 1, %v31_v43 }
   0xc   :  { %485 = vmatprep.mubr.msk.f32.mxu0 %vm576_vm0, %v577_v6  ;;  %v530_v36 = vpack.c.bf16 %v201_v34, %v200_v33  ;;  %v203_v37 = vld [vmem:[%s757_s3 + $0x18] sm:$0xff]  ;;  %v204_v39 = vld [vmem:[%s757_s3 + $0x20] sm:$0xff]  ;;  %v205_v40 = vld [vmem:[%s757_s3 + $0x28] sm:$0xff]  ;;  %v210_v2 = vsub.s32 2, %v31_v43 }
   0xd   :  { %513 = vmatpush3.bf16.msra.mxu1 %v512_v17  ;;  %v533_v38 = vpack.c.bf16 %v203_v37, %v202_v35  ;;  %v536_v41 = vpack.c.bf16 %v205_v40, %v204_v39  ;;  %v25_v45 = vld [vmem:[%s759_s5] sm:$0xf]  ;;  %v206_v51 = vld [vmem:[%s757_s3 + $0x30] sm:$0xff]  ;;  %v207_v52 = vld [vmem:[%s757_s3 + $0x38] sm:$0xff] }
   0xe   :  { %514 = vmatprep.subr.bf16.mxu1 %v575_v3  ;;  %531 = vmatpush3.bf16.msra.mxu0 %v530_v36  ;;  %v33_v46 = vrot.slane %v25_v45, %v32_v44  ;;  %v539_v53 = vpack.c.bf16 %v207_v52, %v206_v51  ;;  %v128_v55 = vrot.slane %v25_v45, %v127_v54  ;;  %v287_v56 = vld [vmem:[%s758_s4] sm:$0xff]  ;;  %v288_v57 = vld [vmem:[%s758_s4 + $0x8] sm:$0xff]  ;;  %v289_v63 = vld [vmem:[%s758_s4 + $0x10] sm:$0xff] }
   0xf   :  { %532 = vmatprep.subr.bf16.mxu0 %v575_v3  ;;  %v542_v61 = vpack.c.bf16 %v288_v57, %v287_v56  ;;  %v290_v0 = vld [vmem:[%s758_s4 + $0x18] sm:$0xff]  ;;  %v211_v4 = vrot.slane %v25_v45, %v210_v2  ;;  %s551_s4 = scalar_lea.vmem %s377_s1, 128 }
  0x10   :  { %v545_v1 = vpack.c.bf16 %v290_v0, %v289_v63  ;;  %p552_p0 = scmp.ne.s32.totalorder %s377_s1, %s551_s4  ;;  %p557_p2 = scmp.lt.s32.totalorder %s551_s4, %s551_s4 }
  0x11   :  { %516 = vmatpush3.bf16.msra.mxu1 %v515_v20 }
  0x12   :  { %517 = vmatprep.subr.bf16.mxu1 %v575_v3  ;;  %534 = vmatpush3.bf16.msra.mxu0 %v533_v38  ;;  %p558_p3 = por %p557_p2, %p556_p1 }
  0x13   :  { %535 = vmatprep.subr.bf16.mxu0 %v575_v3 }
  0x14   :  { %p559_p4 = pnand %p558_p3, %p552_p0 }
  0x15   :  { %519 = vmatpush3.bf16.msra.mxu1 %v518_v23 }
  0x16   :  { %520 = vmatprep.subr.bf16.mxu1 %v575_v3  ;;  %537 = vmatpush3.bf16.msra.mxu0 %v536_v41 }
  0x17   :  { %538 = vmatprep.subr.bf16.mxu0 %v575_v3 }
  0x19   :  { %522 = vmatpush3.bf16.msra.mxu1 %v521_v26 }
  0x1a   :  { %523 = vmatprep.subr.bf16.mxu1 %v575_v3  ;;  %540 = vmatpush3.bf16.msra.mxu0 %v539_v53 }
  0x1b   :  { %541 = vmatprep.subr.bf16.mxu0 %v575_v3 }
  0x1d   :  { %525 = vmatpush3.bf16.msra.mxu1 %v524_v29 }
  0x1e   :  { %526 = vmatprep.subr.bf16.mxu1 %v575_v3 }
  0x21   :  { %528 = vmatpush3.bf16.msra.mxu1 %v527_v32 }
  0xde   :  { %v104_v47 = vpop.f32.mrb[0].mxu0 }
  0xdf   :  { %v105_v48 = vadd.f32 %v104_v47, %v33_v46  ;;  %v433_v49 = vpop.f32.mrb[1].mxu0 }
  0xe1   :  { %v108_v50 = vmax.f32 %v105_v48, 0.0 }
  0xe3   :  { %467 = vmatmul.mubr.f32.vlgmr.msra.gmra.mrb[0].mxu1 %v108_v50 }
 0x1b6   :  { %v195_v58 = vpop.f32.mrb[0].mxu1 }
 0x1b7   :  { %v196_v59 = vadd.f32 %v195_v58, %v128_v55  ;;  %v468_v60 = vpop.f32.mrb[1].mxu1 }
 0x1b9   :  { %v199_v62 = vmax.f32 %v196_v59, 0.0 }
 0x1bb   :  { %486 = vmatmul.mubr.msk.f32.vlgmr.msra.gmra.mrb[2].mxu0 %vm212_vm2, %v199_v62 }
 0x1bc   :  { %543 = vmatpush3.bf16.msra.mxu0 %v542_v61  ;;  %496 = vmatprep.mubr.msk.f32.mxu0 %vm576_vm0, %v577_v6  ;;  %v293_v6 = vsub.s32 3, %v31_v43 }
 0x1bd   :  { %544 = vmatprep.subr.bf16.mxu0 %v575_v3 }
 0x1be   :  { %v294_v3 = vrot.slane %v25_v45, %v293_v6 }
 0x1c0   :  { %546 = vmatpush3.bf16.msra.mxu0 %v545_v1 }
 0x28e   :  { %v282_v5 = vpop.f32.mrb[2].mxu0 }
 0x28f   :  { %v283_v7 = vadd.f32 %v282_v5, %v211_v4  ;;  %v487_v8 = vpop.f32.mrb[3].mxu0 }
 0x291   :  { %v286_v9 = vmax.f32 %v283_v7, 0.0 }
 0x293   :  { %497 = vmatmul.mubr.msk.f32.vlgmr.msra.gmra.mrb[4].mxu0 %vm34_vm1, %v286_v9 }
 0x366   :  { %v364_v10 = vpop.f32.mrb[4].mxu0 }
 0x367   :  { %v365_v11 = vadd.f32 %v364_v10, %v294_v3  ;;  %v498_v12 = vpop.f32.mrb[5].mxu0 }
 0x369   :  { %369 = vst.msk [vmem:[#allocation2] sm:$0xff] %vm368_vm3, %v365_v11 }
 0x36a   :  { %562 = shalt.err (!%p559_p4)
}
 0x36b   :  { %s563_s13 = scalar_lea.hbm %s760_s6, 128 }
 0x36c   :  { %p564_p5 = scmp.ne.s32.totalorder %s760_s6, %s563_s13  ;;  %p567_p6 = scmp.lt.u32.totalorder %s563_s13, %s760_s6 }
 0x36e   :  { %p569_p7 = pnand %p567_p6, %p564_p5 }
 0x370   :  { %572 = shalt.err (!%p569_p7)
}
 0x371   :  { %379 = dma.vmem_to_hbm [thread:$0]  %s377_s1, 128, %s760_s6, [#allocation3]  }
 0x372   :  { %573 = dma.done.wait [#allocation3], 128  }
 0x373   :  { %574 = vsyncadd [#allocation3], 4294967168 }
 0x374   :  { %383 = vsyncpa [#allocation3], 1 }

</bundles_post_ra>
